<compile_context>
chip_gen: v7x
topology: tpu7x:2x2x1
jax: 0.10.0
libtpu: 0.0.40
codegen_flags: <defaults>
</compile_context>

<pallas_src>
import jax
import jax.numpy as jnp
from jax import lax
from jax.experimental import pallas as pl
from jax.experimental.pallas import tpu as pltpu

_LANE = 128
_SUBLANE = 8
# Max rows (of 128 f32 lanes) per input tile: 1024 * 128 * 4 B = 512 KiB.
# 8 inputs x 2 pipeline buffers x 512 KiB = 8 MiB -> safe under the scoped VMEM
# default on v5e (16 MiB) and v6e/v7x (32 MiB).  1024-row tiles already sit at
# the measured roofline knee for mem-bound elementwise work on v6e.
_MAX_TILE_ROWS = 1024
# Gate-logit padding value: exp(-1e4) == 0.0 exactly in f32, so a padded
# (g, t) = (-1e4, 0) element contributes exactly 0 to the BCE-with-logits sum.
_GATE_PAD = -1.0e4


def _round_up(x, m):
    return (x + m - 1) // m * m


def _to_lane_rows(x, pad_value):
    """Flatten to 1D, pad to a multiple of 128, reshape to lane-dense [rows, 128]."""
    flat = jnp.ravel(x)
    n = flat.shape[0]
    n_pad = _round_up(n, _LANE)
    if n_pad != n:
        flat = jnp.pad(flat, (0, n_pad - n), constant_values=pad_value)
    return flat.reshape(n_pad // _LANE, _LANE)


def _pad_rows(x2d, total_rows, pad_value):
    rows = x2d.shape[0]
    if total_rows != rows:
        x2d = jnp.pad(x2d, ((0, total_rows - rows), (0, 0)),
                      constant_values=pad_value)
    return x2d


# ----------------------------------------------------------------------------
# Fused loss kernel: one grid step reduces one row-tile of every input and
# emits 6 partial sums packed into sublane 0 / lanes 0..5 of an (8,128) block:
#   lane 0: sum((mel_out     - mel_tgt)^2)
#   lane 1: sum((mel_postnet - mel_tgt)^2)
#   lane 2: sum(BCE-with-logits(gate_out, gate_tgt))
#   lane 3: sum(z * z)
#   lane 4: sum(log_s)
#   lane 5: sum(log_det_W)
# ----------------------------------------------------------------------------
def _fused_loss_kernel(mel_out_ref, mel_post_ref, mel_tgt_ref,
                       gate_out_ref, gate_tgt_ref,
                       z_ref, log_s_ref, log_det_w_ref, out_ref):
    f32 = jnp.float32

    # Elementwise work on the VPU; full reductions on the XLU; exp/log1p on the
    # EUP — all different bundle slots, so this kernel is HBM-bandwidth bound.
    mel_tgt = mel_tgt_ref[...].astype(f32)
    d1 = mel_out_ref[...].astype(f32) - mel_tgt
    d2 = mel_post_ref[...].astype(f32) - mel_tgt
    sse1 = jnp.sum(d1 * d1)
    sse2 = jnp.sum(d2 * d2)

    # Numerically stable BCE-with-logits (matches torch.nn.BCEWithLogitsLoss).
    g = gate_out_ref[...].astype(f32)
    t = gate_tgt_ref[...].astype(f32)
    bce = jnp.sum(jnp.maximum(g, 0.0) - g * t + jnp.log1p(jnp.exp(-jnp.abs(g))))

    z = z_ref[...].astype(f32)
    zsq = jnp.sum(z * z)
    ls = jnp.sum(log_s_ref[...].astype(f32))
    ldw = jnp.sum(log_det_w_ref[...].astype(f32))

    # Pack the 6 partial sums into a lane-dense (8,128) block (sublane 0 only),
    # so the store is a full unmasked vst.  Iotas/masks hoisted once.
    sub = lax.broadcasted_iota(jnp.int32, (_SUBLANE, _LANE), 0)
    lane = lax.broadcasted_iota(jnp.int32, (_SUBLANE, _LANE), 1)
    row0 = sub == 0
    packed = jnp.zeros((_SUBLANE, _LANE), f32)
    for k, v in enumerate((sse1, sse2, bce, zsq, ls, ldw)):
        packed = jnp.where(row0 & (lane == k), v, packed)
    out_ref[...] = packed


def _fused_losses(mel_out, mel_post, mel_tgt, gate_out, gate_tgt,
                  z, log_s, log_det_w):
    """Returns the 6 global sums (f32 scalars) via one fused pallas_call."""
    raw = [
        (mel_out, 0.0), (mel_post, 0.0), (mel_tgt, 0.0),
        (gate_out, _GATE_PAD), (gate_tgt, 0.0),
        (z, 0.0), (log_s, 0.0), (log_det_w, 0.0),
    ]
    two_d = [(_to_lane_rows(a, pv), pv) for a, pv in raw]

    # One common grid: row-tile every input so the largest tile stays under
    # _MAX_TILE_ROWS; every block shape is (multiple-of-8, 128).
    max_rows = max(a.shape[0] for a, _ in two_d)
    num_tiles = max(1, pl.cdiv(max_rows, _MAX_TILE_ROWS))

    ins, in_specs = [], []
    for a, pv in two_d:
        tile_rows = _round_up(pl.cdiv(a.shape[0], num_tiles), _SUBLANE)
        a = _pad_rows(a, tile_rows * num_tiles, pv)
        ins.append(a)
        in_specs.append(pl.BlockSpec((tile_rows, _LANE), lambda i: (i, 0)))

    total_elems = sum(int(a.size) for a in ins)
    bytes_accessed = (sum(int(a.size) * a.dtype.itemsize for a in ins)
                      + int(num_tiles) * _SUBLANE * _LANE * 4)
    cost = pl.CostEstimate(flops=3 * total_elems,
                           transcendentals=2 * int(ins[3].size),
                           bytes_accessed=bytes_accessed)

    partials = pl.pallas_call(
        _fused_loss_kernel,
        out_shape=jax.ShapeDtypeStruct((int(num_tiles) * _SUBLANE, _LANE),
                                       jnp.float32),
        grid=(num_tiles,),
        in_specs=in_specs,
        out_specs=pl.BlockSpec((_SUBLANE, _LANE), lambda i: (i, 0)),
        compiler_params=pltpu.CompilerParams(
            dimension_semantics=("parallel",)),
        cost_estimate=cost,
    )(*ins)

    # Tiny finalize in the wrapper; only sublane 0 of each block is nonzero.
    sums = jnp.sum(partials, axis=0)
    return sums[0], sums[1], sums[2], sums[3], sums[4], sums[5]


# ----------------------------------------------------------------------------
# trainer.forward() analogue: Tacotron2Loss + WaveGlowLoss, fused.
# ----------------------------------------------------------------------------
def trainer_forward(y_pred, mel_gt, waveglow_outputs, sigma):
    """y_pred = (mel_out, mel_out_postnet, gate_out); mel_gt = (mel_target, gate_target);
    waveglow_outputs = (z, log_s, log_det_W)."""
    mel_out, mel_post, gate_out = y_pred
    mel_tgt, gate_tgt = mel_gt
    z, log_s, log_det_w = waveglow_outputs

    numel_mel = float(mel_out.size)
    numel_gate = float(gate_out.size)
    numel_z = float(z.size)

    sse1, sse2, bce_sum, zsq, ls_sum, ldw_sum = _fused_losses(
        mel_out, mel_post, mel_tgt, gate_out, gate_tgt, z, log_s, log_det_w)

    # Means use the TRUE element counts (padding never reaches the divisors).
    l_taco = (sse1 + sse2) / numel_mel + bce_sum / numel_gate
    l_wg = (zsq / (2.0 * float(sigma) ** 2) - ls_sum - ldw_sum) / numel_z
    total = l_taco + l_wg
    return {"loss": total, "loss tacotron": l_taco, "loss waveglow": l_wg}


if __name__ == "__main__":
    key = jax.random.PRNGKey(0)
    ks = jax.random.split(key, 8)

    # Small shapes consistent with Tacotron2 / WaveGlow outputs.
    B, n_mel, T = 2, 8, 16          # mel spectrogram: [B, n_mel, T]
    C, L = 8, 128                   # WaveGlow latent: [B, C, L]
    n_flows = 8
    sigma = 1.0                     # hparams['sigma']

    mel_out = jax.random.normal(ks[0], (B, n_mel, T), jnp.float32)
    mel_post = jax.random.normal(ks[1], (B, n_mel, T), jnp.float32)
    gate_out = jax.random.normal(ks[2], (B, T), jnp.float32)
    mel_tgt = jax.random.normal(ks[3], (B, n_mel, T), jnp.float32)
    gate_tgt = (jax.random.uniform(ks[4], (B, T)) > 0.9).astype(jnp.float32)

    z = jax.random.normal(ks[5], (B, C, L), jnp.float32)
    log_s = 0.1 * jax.random.normal(ks[6], (B, C, L), jnp.float32)
    log_det_w = 0.05 * jax.random.normal(ks[7], (1, n_flows), jnp.float32)

    out = trainer_forward((mel_out, mel_post, gate_out),
                          (mel_tgt, gate_tgt),
                          (z, log_s, log_det_w),
                          sigma)
    jax.block_until_ready(out["loss"])

    # Pure-JAX reference check.
    ref_taco = (jnp.mean((mel_out - mel_tgt) ** 2)
                + jnp.mean((mel_post - mel_tgt) ** 2)
                + jnp.mean(jnp.maximum(gate_out, 0.0) - gate_out * gate_tgt
                           + jnp.log1p(jnp.exp(-jnp.abs(gate_out)))))
    ref_wg = ((jnp.sum(z * z) / (2.0 * sigma ** 2)
               - jnp.sum(log_s) - jnp.sum(log_det_w)) / (B * C * L))
    ref_total = ref_taco + ref_wg
    assert jnp.allclose(out["loss tacotron"], ref_taco, rtol=1e-5, atol=1e-5)
    assert jnp.allclose(out["loss waveglow"], ref_wg, rtol=1e-5, atol=1e-5)
    assert jnp.allclose(out["loss"], ref_total, rtol=1e-5, atol=1e-5)

    print("KERNEL_OK")
</pallas_src>

<mosaic_0001>
module attributes {stable_mosaic.version = 11 : i64} {
  func.func @_fused_loss_kernel(%arg0: i32, %arg1: memref<8x128xf32, #tpu.memory_space<vmem>>, %arg2: memref<8x128xf32, #tpu.memory_space<vmem>>, %arg3: memref<8x128xf32, #tpu.memory_space<vmem>>, %arg4: memref<8x128xf32, #tpu.memory_space<vmem>>, %arg5: memref<8x128xf32, #tpu.memory_space<vmem>>, %arg6: memref<16x128xf32, #tpu.memory_space<vmem>>, %arg7: memref<16x128xf32, #tpu.memory_space<vmem>>, %arg8: memref<8x128xf32, #tpu.memory_space<vmem>>, %arg9: memref<8x128xf32, #tpu.memory_space<vmem>>) attributes {dimension_semantics = [#tpu.dimension_semantics<parallel>], iteration_bounds = array<i64: 1>, scalar_prefetch = 0 : i64, scratch_operands = 0 : i64, tpu.core_type = #tpu.core_type<tc>, window_params = [{transform_indices = @transform_0, window_bounds = array<i64: 8, 128>}, {transform_indices = @transform_1, window_bounds = array<i64: 8, 128>}, {transform_indices = @transform_2, window_bounds = array<i64: 8, 128>}, {transform_indices = @transform_3, window_bounds = array<i64: 8, 128>}, {transform_indices = @transform_4, window_bounds = array<i64: 8, 128>}, {transform_indices = @transform_5, window_bounds = array<i64: 16, 128>}, {transform_indices = @transform_6, window_bounds = array<i64: 16, 128>}, {transform_indices = @transform_7, window_bounds = array<i64: 8, 128>}, {transform_indices = @transform_8, window_bounds = array<i64: 8, 128>}]} {
    %c0 = arith.constant 0 : index
    %c0_0 = arith.constant 0 : index
    %0 = vector.load %arg3[%c0, %c0_0] : memref<8x128xf32, #tpu.memory_space<vmem>>, vector<8x128xf32>
    %c0_1 = arith.constant 0 : index
    %c0_2 = arith.constant 0 : index
    %1 = vector.load %arg1[%c0_1, %c0_2] : memref<8x128xf32, #tpu.memory_space<vmem>>, vector<8x128xf32>
    %2 = arith.subf %1, %0 : vector<8x128xf32>
    %c0_3 = arith.constant 0 : index
    %c0_4 = arith.constant 0 : index
    %3 = vector.load %arg2[%c0_3, %c0_4] : memref<8x128xf32, #tpu.memory_space<vmem>>, vector<8x128xf32>
    %4 = arith.subf %3, %0 : vector<8x128xf32>
    %5 = arith.mulf %2, %2 : vector<8x128xf32>
    %6 = vector.shape_cast %5 : vector<8x128xf32> to vector<1x8x128xf32>
    %cst = arith.constant dense<0.000000e+00> : vector<1xf32>
    %7 = vector.multi_reduction <add>, %6, %cst [1, 2] : vector<1x8x128xf32> to vector<1xf32>
    %8 = vector.shape_cast %7 : vector<1xf32> to vector<1x1x1xf32>
    %9 = vector.extract %8[0, 0, 0] : f32 from vector<1x1x1xf32>
    %10 = arith.mulf %4, %4 : vector<8x128xf32>
    %11 = vector.shape_cast %10 : vector<8x128xf32> to vector<1x8x128xf32>
    %cst_5 = arith.constant dense<0.000000e+00> : vector<1xf32>
    %12 = vector.multi_reduction <add>, %11, %cst_5 [1, 2] : vector<1x8x128xf32> to vector<1xf32>
    %13 = vector.shape_cast %12 : vector<1xf32> to vector<1x1x1xf32>
    %14 = vector.extract %13[0, 0, 0] : f32 from vector<1x1x1xf32>
    %c0_6 = arith.constant 0 : index
    %c0_7 = arith.constant 0 : index
    %15 = vector.load %arg4[%c0_6, %c0_7] : memref<8x128xf32, #tpu.memory_space<vmem>>, vector<8x128xf32>
    %c0_8 = arith.constant 0 : index
    %c0_9 = arith.constant 0 : index
    %16 = vector.load %arg5[%c0_8, %c0_9] : memref<8x128xf32, #tpu.memory_space<vmem>>, vector<8x128xf32>
    %cst_10 = arith.constant 0.000000e+00 : f32
    %17 = vector.broadcast %cst_10 : f32 to vector<8x128xf32>
    %18 = arith.maximumf %15, %17 : vector<8x128xf32>
    %19 = arith.mulf %15, %16 : vector<8x128xf32>
    %20 = arith.subf %18, %19 : vector<8x128xf32>
    %21 = math.absf %15 : vector<8x128xf32>
    %cst_11 = arith.constant 0.000000e+00 : f32
    %22 = vector.broadcast %cst_11 : f32 to vector<8x128xf32>
    %23 = arith.subf %22, %21 : vector<8x128xf32>
    %24 = math.exp %23 : vector<8x128xf32>
    %25 = math.log1p %24 : vector<8x128xf32>
    %26 = arith.addf %20, %25 : vector<8x128xf32>
    %27 = vector.shape_cast %26 : vector<8x128xf32> to vector<1x8x128xf32>
    %cst_12 = arith.constant dense<0.000000e+00> : vector<1xf32>
    %28 = vector.multi_reduction <add>, %27, %cst_12 [1, 2] : vector<1x8x128xf32> to vector<1xf32>
    %29 = vector.shape_cast %28 : vector<1xf32> to vector<1x1x1xf32>
    %30 = vector.extract %29[0, 0, 0] : f32 from vector<1x1x1xf32>
    %c0_13 = arith.constant 0 : index
    %c0_14 = arith.constant 0 : index
    %31 = vector.load %arg6[%c0_13, %c0_14] : memref<16x128xf32, #tpu.memory_space<vmem>>, vector<16x128xf32>
    %32 = arith.mulf %31, %31 : vector<16x128xf32>
    %33 = vector.shape_cast %32 : vector<16x128xf32> to vector<1x16x128xf32>
    %cst_15 = arith.constant dense<0.000000e+00> : vector<1xf32>
    %34 = vector.multi_reduction <add>, %33, %cst_15 [1, 2] : vector<1x16x128xf32> to vector<1xf32>
    %35 = vector.shape_cast %34 : vector<1xf32> to vector<1x1x1xf32>
    %36 = vector.extract %35[0, 0, 0] : f32 from vector<1x1x1xf32>
    %c0_16 = arith.constant 0 : index
    %c0_17 = arith.constant 0 : index
    %37 = vector.load %arg7[%c0_16, %c0_17] : memref<16x128xf32, #tpu.memory_space<vmem>>, vector<16x128xf32>
    %38 = vector.shape_cast %37 : vector<16x128xf32> to vector<1x16x128xf32>
    %cst_18 = arith.constant dense<0.000000e+00> : vector<1xf32>
    %39 = vector.multi_reduction <add>, %38, %cst_18 [1, 2] : vector<1x16x128xf32> to vector<1xf32>
    %40 = vector.shape_cast %39 : vector<1xf32> to vector<1x1x1xf32>
    %41 = vector.extract %40[0, 0, 0] : f32 from vector<1x1x1xf32>
    %c0_19 = arith.constant 0 : index
    %c0_20 = arith.constant 0 : index
    %42 = vector.load %arg8[%c0_19, %c0_20] : memref<8x128xf32, #tpu.memory_space<vmem>>, vector<8x128xf32>
    %43 = vector.shape_cast %42 : vector<8x128xf32> to vector<1x8x128xf32>
    %cst_21 = arith.constant dense<0.000000e+00> : vector<1xf32>
    %44 = vector.multi_reduction <add>, %43, %cst_21 [1, 2] : vector<1x8x128xf32> to vector<1xf32>
    %45 = vector.shape_cast %44 : vector<1xf32> to vector<1x1x1xf32>
    %46 = vector.extract %45[0, 0, 0] : f32 from vector<1x1x1xf32>
    %47 = tpu.iota {dimensions = array<i32: 0>} : vector<8x128xi32>
    %48 = tpu.iota {dimensions = array<i32: 1>} : vector<8x128xi32>
    %c0_i32 = arith.constant 0 : i32
    %49 = vector.broadcast %c0_i32 : i32 to vector<8x128xi32>
    %50 = arith.cmpi eq, %47, %49 : vector<8x128xi32>
    %cst_22 = arith.constant 0.000000e+00 : f32
    %51 = vector.broadcast %cst_22 : f32 to vector<8x128xf32>
    %c0_i32_23 = arith.constant 0 : i32
    %52 = vector.broadcast %c0_i32_23 : i32 to vector<8x128xi32>
    %53 = arith.cmpi eq, %48, %52 : vector<8x128xi32>
    %54 = arith.andi %50, %53 : vector<8x128xi1>
    %55 = vector.broadcast %9 : f32 to vector<8x128xf32>
    %56 = arith.select %54, %55, %51 : vector<8x128xi1>, vector<8x128xf32>
    %c1_i32 = arith.constant 1 : i32
    %57 = vector.broadcast %c1_i32 : i32 to vector<8x128xi32>
    %58 = arith.cmpi eq, %48, %57 : vector<8x128xi32>
    %59 = arith.andi %50, %58 : vector<8x128xi1>
    %60 = vector.broadcast %14 : f32 to vector<8x128xf32>
    %61 = arith.select %59, %60, %56 : vector<8x128xi1>, vector<8x128xf32>
    %c2_i32 = arith.constant 2 : i32
    %62 = vector.broadcast %c2_i32 : i32 to vector<8x128xi32>
    %63 = arith.cmpi eq, %48, %62 : vector<8x128xi32>
    %64 = arith.andi %50, %63 : vector<8x128xi1>
    %65 = vector.broadcast %30 : f32 to vector<8x128xf32>
    %66 = arith.select %64, %65, %61 : vector<8x128xi1>, vector<8x128xf32>
    %c3_i32 = arith.constant 3 : i32
    %67 = vector.broadcast %c3_i32 : i32 to vector<8x128xi32>
    %68 = arith.cmpi eq, %48, %67 : vector<8x128xi32>
    %69 = arith.andi %50, %68 : vector<8x128xi1>
    %70 = vector.broadcast %36 : f32 to vector<8x128xf32>
    %71 = arith.select %69, %70, %66 : vector<8x128xi1>, vector<8x128xf32>
    %c4_i32 = arith.constant 4 : i32
    %72 = vector.broadcast %c4_i32 : i32 to vector<8x128xi32>
    %73 = arith.cmpi eq, %48, %72 : vector<8x128xi32>
    %74 = arith.andi %50, %73 : vector<8x128xi1>
    %75 = vector.broadcast %41 : f32 to vector<8x128xf32>
    %76 = arith.select %74, %75, %71 : vector<8x128xi1>, vector<8x128xf32>
    %c5_i32 = arith.constant 5 : i32
    %77 = vector.broadcast %c5_i32 : i32 to vector<8x128xi32>
    %78 = arith.cmpi eq, %48, %77 : vector<8x128xi32>
    %79 = arith.andi %50, %78 : vector<8x128xi1>
    %80 = vector.broadcast %46 : f32 to vector<8x128xf32>
    %81 = arith.select %79, %80, %76 : vector<8x128xi1>, vector<8x128xf32>
    %c0_24 = arith.constant 0 : index
    %c0_25 = arith.constant 0 : index
    %82 = vector.load %arg9[%c0_24, %c0_25] : memref<8x128xf32, #tpu.memory_space<vmem>>, vector<8x128xf32>
    tpu.vector_store %arg9[%c0_24, %c0_25], %81 {strides = array<i32>} : memref<8x128xf32, #tpu.memory_space<vmem>>, vector<8x128xf32>,
    return
  }
  func.func @transform_0(%arg0: i32) -> (i32, i32) {
    %c0_i32 = arith.constant 0 : i32
    %c0_i32_0 = arith.constant 0 : i32
    return %arg0, %c0_i32 : i32, i32
  }
  func.func @transform_1(%arg0: i32) -> (i32, i32) {
    %c0_i32 = arith.constant 0 : i32
    %c0_i32_0 = arith.constant 0 : i32
    return %arg0, %c0_i32 : i32, i32
  }
  func.func @transform_2(%arg0: i32) -> (i32, i32) {
    %c0_i32 = arith.constant 0 : i32
    %c0_i32_0 = arith.constant 0 : i32
    return %arg0, %c0_i32 : i32, i32
  }
  func.func @transform_3(%arg0: i32) -> (i32, i32) {
    %c0_i32 = arith.constant 0 : i32
    %c0_i32_0 = arith.constant 0 : i32
    return %arg0, %c0_i32 : i32, i32
  }
  func.func @transform_4(%arg0: i32) -> (i32, i32) {
    %c0_i32 = arith.constant 0 : i32
    %c0_i32_0 = arith.constant 0 : i32
    return %arg0, %c0_i32 : i32, i32
  }
  func.func @transform_5(%arg0: i32) -> (i32, i32) {
    %c0_i32 = arith.constant 0 : i32
    %c0_i32_0 = arith.constant 0 : i32
    return %arg0, %c0_i32 : i32, i32
  }
  func.func @transform_6(%arg0: i32) -> (i32, i32) {
    %c0_i32 = arith.constant 0 : i32
    %c0_i32_0 = arith.constant 0 : i32
    return %arg0, %c0_i32 : i32, i32
  }
  func.func @transform_7(%arg0: i32) -> (i32, i32) {
    %c0_i32 = arith.constant 0 : i32
    %c0_i32_0 = arith.constant 0 : i32
    return %arg0, %c0_i32 : i32, i32
  }
  func.func @transform_8(%arg0: i32) -> (i32, i32) {
    %c0_i32 = arith.constant 0 : i32
    %c0_i32_0 = arith.constant 0 : i32
    return %arg0, %c0_i32 : i32, i32
  }
}

</mosaic_0001>

<bundles_post_ra>
// kernel: tpu_custom_call.1
= control target key start
LH: loop header
LB: loop body
LE: loop exit
PB: predicated region body
PF: predicated region fallthrough
CT: control target
= control target key end

     0   :  { %13 = vsyncpa [#allocation3], 0  ;;  %s588_s0 = inlined_call_operand.hbm [shape: f32[8,128], index: 0, kind: input, shape index: {}]   ;;  %s589_s1 = inlined_call_operand.hbm [shape: f32[8,128], index: 1, kind: input, shape index: {}]   ;;  %s590_s2 = inlined_call_operand.hbm [shape: f32[8,128], index: 2, kind: input, shape index: {}]   ;;  %s591_s3 = inlined_call_operand.hbm [shape: f32[8,128], index: 3, kind: input, shape index: {}]   ;;  %s592_s4 = inlined_call_operand.hbm [shape: f32[8,128], index: 4, kind: input, shape index: {}]   ;;  %s593_s5 = inlined_call_operand.vmem [shape: f32[16,128], index: 5, kind: input, shape index: {}]   ;;  %s594_s6 = inlined_call_operand.hbm [shape: f32[16,128], index: 6, kind: input, shape index: {}]   ;;  %s595_s7 = inlined_call_operand.vmem [shape: f32[8,128], index: 7, kind: input, shape index: {}]   ;;  %s596_s8 = inlined_call_operand.hbm [shape: f32[8,128], index: 8, kind: output, shape index: {}]  }
   0x1   :  { %14 = vsyncpa [#allocation6], 0 }
   0x2   :  { %15 = vsyncpa [#allocation9], 0 }
   0x3   :  { %16 = vsyncpa [#allocation12], 0 }
   0x4   :  { %17 = vsyncpa [#allocation4], 0  ;;  %s428_s27 = smov [#allocation5]   ;;  %s429_s29 = smov [#allocation8]  }
   0x5   :  { %s34_s28 = sshll.u32 %s428_s27, 4  ;;  %s54_s30 = sshll.u32 %s429_s29, 4  ;;  %s35_s28 = int_to_ptr.vmem [resolvable:$true] %s34_s28  ;;  %s55_s30 = int_to_ptr.vmem [resolvable:$true] %s54_s30 }
   0x6   :  { %s264_s11 = scalar_lea.hbm %s589_s1, 128 }
   0x7   :  { %p265_p0 = scmp.ne.s32.totalorder %s589_s1, %s264_s11  ;;  %p268_p1 = scmp.lt.u32.totalorder %s264_s11, %s589_s1 }
   0x9   :  { %p270_p2 = pnand %p268_p1, %p265_p0 }
   0xb   :  { %273 = shalt.err (!%p270_p2)
}
   0xc   :  { %s274_s16 = scalar_lea.vmem %s35_s28, 128  ;;  %p279_p4 = scmp.lt.s32.totalorder %s35_s28, %s35_s28 }
   0xd   :  { %p275_p3 = scmp.ne.s32.totalorder %s35_s28, %s274_s16  ;;  %p280_p5 = scmp.lt.s32.totalorder %s274_s16, %s274_s16 }
   0xf   :  { %p281_p6 = por %p280_p5, %p279_p4 }
  0x11   :  { %p282_p7 = pnand %p281_p6, %p275_p3 }
  0x13   :  { %285 = shalt.err (!%p282_p7)
}
  0x14   :  { %37 = dma.hbm_to_vmem [thread:$0]  %s589_s1, 128, %s35_s28, [#allocation6]  }
  0x15   :  { %s286_s21 = scalar_lea.hbm %s591_s3, 128 }
  0x16   :  { %p287_p8 = scmp.ne.s32.totalorder %s591_s3, %s286_s21  ;;  %p290_p9 = scmp.lt.u32.totalorder %s286_s21, %s591_s3 }
  0x18   :  { %p292_p10 = pnand %p290_p9, %p287_p8 }
  0x1a   :  { %295 = shalt.err (!%p292_p10)
}
  0x1b   :  { %s296_s26 = scalar_lea.vmem %s55_s30, 128  ;;  %p301_p12 = scmp.lt.s32.totalorder %s55_s30, %s55_s30 }
  0x1c   :  { %p297_p11 = scmp.ne.s32.totalorder %s55_s30, %s296_s26  ;;  %p302_p13 = scmp.lt.s32.totalorder %s296_s26, %s296_s26 }
  0x1e   :  { %p303_p0 = por %p302_p13, %p301_p12 }
  0x20   :  { %p304_p1 = pnand %p303_p0, %p297_p11 }
  0x22   :  { %307 = shalt.err (!%p304_p1)
}
  0x23   :  { %57 = dma.hbm_to_vmem [thread:$0]  %s591_s3, 128, %s55_s30, [#allocation9]  }
  0x24   :  { %s430_s28 = smov [#allocation2]   ;;  %s431_s9 = smov [#allocation7]  }
  0x25   :  { %s24_s29 = sshll.u32 %s430_s28, 4  ;;  %s44_s10 = sshll.u32 %s431_s9, 4  ;;  %s25_s29 = int_to_ptr.vmem [resolvable:$true] %s24_s29  ;;  %s45_s10 = int_to_ptr.vmem [resolvable:$true] %s44_s10 }
  0x26   :  { %s308_s13 = scalar_lea.hbm %s588_s0, 128 }
  0x27   :  { %p309_p2 = scmp.ne.s32.totalorder %s588_s0, %s308_s13  ;;  %p312_p3 = scmp.lt.u32.totalorder %s308_s13, %s588_s0 }
  0x29   :  { %p314_p4 = pnand %p312_p3, %p309_p2 }
  0x2b   :  { %317 = shalt.err (!%p314_p4)
}
  0x2c   :  { %s318_s3 = scalar_lea.vmem %s25_s29, 128  ;;  %p323_p6 = scmp.lt.s32.totalorder %s25_s29, %s25_s29 }
  0x2d   :  { %p319_p5 = scmp.ne.s32.totalorder %s25_s29, %s318_s3  ;;  %p324_p7 = scmp.lt.s32.totalorder %s318_s3, %s318_s3 }
  0x2f   :  { %p325_p8 = por %p324_p7, %p323_p6 }
  0x31   :  { %p326_p9 = pnand %p325_p8, %p319_p5 }
  0x33   :  { %329 = shalt.err (!%p326_p9)
}
  0x34   :  { %27 = dma.hbm_to_vmem [thread:$0]  %s588_s0, 128, %s25_s29, [#allocation3]  }
  0x35   :  { %s330_s21 = scalar_lea.hbm %s590_s2, 128 }
  0x36   :  { %p331_p10 = scmp.ne.s32.totalorder %s590_s2, %s330_s21  ;;  %p334_p11 = scmp.lt.u32.totalorder %s330_s21, %s590_s2 }
  0x38   :  { %p336_p12 = pnand %p334_p11, %p331_p10 }
  0x3a   :  { %339 = shalt.err (!%p336_p12)
}
  0x3b   :  { %s340_s26 = scalar_lea.vmem %s45_s10, 128  ;;  %p345_p0 = scmp.lt.s32.totalorder %s45_s10, %s45_s10 }
  0x3c   :  { %p341_p13 = scmp.ne.s32.totalorder %s45_s10, %s340_s26  ;;  %p346_p1 = scmp.lt.s32.totalorder %s340_s26, %s340_s26 }
  0x3e   :  { %p347_p2 = por %p346_p1, %p345_p0 }
  0x40   :  { %p348_p3 = pnand %p347_p2, %p341_p13 }
  0x42   :  { %351 = shalt.err (!%p348_p3)
}
  0x43   :  { %47 = dma.hbm_to_vmem [thread:$0]  %s590_s2, 128, %s45_s10, [#allocation6]  }
  0x44   :  { %s432_s27 = smov [#allocation10]   ;;  %s433_s29 = smov [#allocation11]  }
  0x45   :  { %s64_s28 = sshll.u32 %s432_s27, 4  ;;  %s75_s9 = sshll.u32 %s433_s29, 4  ;;  %s65_s28 = int_to_ptr.vmem [resolvable:$true] %s64_s28  ;;  %s530_s9 = int_to_ptr.vmem [resolvable:$true] %s75_s9 }
  0x46   :  { %s352_s13 = scalar_lea.hbm %s592_s4, 128 }
  0x47   :  { %p353_p4 = scmp.ne.s32.totalorder %s592_s4, %s352_s13  ;;  %p356_p5 = scmp.lt.u32.totalorder %s352_s13, %s592_s4 }
  0x49   :  { %p358_p6 = pnand %p356_p5, %p353_p4 }
  0x4b   :  { %361 = shalt.err (!%p358_p6)
}
  0x4c   :  { %s362_s2 = scalar_lea.vmem %s65_s28, 128  ;;  %p367_p8 = scmp.lt.s32.totalorder %s65_s28, %s65_s28 }
  0x4d   :  { %p363_p7 = scmp.ne.s32.totalorder %s65_s28, %s362_s2  ;;  %p368_p9 = scmp.lt.s32.totalorder %s362_s2, %s362_s2 }
  0x4f   :  { %p369_p10 = por %p368_p9, %p367_p8 }
  0x51   :  { %p370_p11 = pnand %p369_p10, %p363_p7 }
  0x53   :  { %373 = shalt.err (!%p370_p11)
}
  0x54   :  { %67 = dma.hbm_to_vmem [thread:$0]  %s592_s4, 128, %s65_s28, [#allocation9]  }
  0x55   :  { %s374_s19 = scalar_lea.hbm %s594_s6, 256 }
  0x56   :  { %p375_p12 = scmp.ne.s32.totalorder %s594_s6, %s374_s19  ;;  %p378_p13 = scmp.lt.u32.totalorder %s374_s19, %s594_s6 }
  0x58   :  { %p380_p0 = pnand %p378_p13, %p375_p12 }
  0x5a   :  { %383 = shalt.err (!%p380_p0)
}
  0x5b   :  { %s384_s24 = scalar_lea.vmem %s530_s9, 256  ;;  %p389_p2 = scmp.lt.s32.totalorder %s530_s9, %s530_s9 }
  0x5c   :  { %p385_p1 = scmp.ne.s32.totalorder %s530_s9, %s384_s24  ;;  %p390_p3 = scmp.lt.s32.totalorder %s384_s24, %s384_s24 }
  0x5e   :  { %p391_p4 = por %p390_p3, %p389_p2 }
  0x60   :  { %p392_p5 = pnand %p391_p4, %p385_p1 }
  0x62   :  { %395 = shalt.err (!%p392_p5)
}
  0x63   :  { %s434_s4 = smov 128   ;;  %s435_s25 = smov 8  }
  0x64   :  { %81 = dma.hbm_to_vmem [thread:$0]  %s594_s6, 256, %s530_s9, [#allocation12], %s434_s4, %s434_s4, %s435_s25  }
  0x65   :  { %418 = dma.done.wait [#allocation3], 128  }
  0x66   :  { %419 = vsyncadd [#allocation3], 4294967168 }
  0x67   :  { %420 = dma.done.wait [#allocation6], 256  }
  0x68   :  { %421 = vsyncadd [#allocation6], 4294967040 }
  0x69   :  { %422 = dma.done.wait [#allocation9], 256  }
  0x6a   :  { %423 = vsyncadd [#allocation9], 4294967040 }
  0x6b   :  { %424 = dma.done.wait [#allocation12], 256  }
  0x6c   :  { %425 = vsyncadd [#allocation12], 4294967040  ;;  %v102_v0 = vld [vmem:[#allocation7] sm:$0xff]  ;;  %v103_v1 = vld [vmem:[#allocation2] sm:$0xff]  ;;  %s436_s14 = smov [#allocation13]  }
  0x6d   :  { %v155_v2 = vld [vmem:[%s593_s5] sm:$0xff]  ;;  %v104_v3 = vsub.f32 %v103_v1, %v102_v0  ;;  %v156_v4 = vld [vmem:[%s593_s5 + $0x8] sm:$0xff]  ;;  %v105_v6 = vld [vmem:[#allocation5] sm:$0xff]  ;;  %s227_s15 = sshll.u32 %s436_s14, 4  ;;  %s228_s15 = int_to_ptr.vmem [resolvable:$true] %s227_s15 }
  0x6e   :  { %v157_v5 = vmul.f32 %v155_v2, %v155_v2  ;;  %v158_v7 = vmul.f32 %v156_v4, %v156_v4  ;;  %v106_v8 = vsub.f32 %v105_v6, %v102_v0  ;;  %v127_v9 = vld [vmem:[#allocation8] sm:$0xff]  ;;  %v169_v14 = vld [vmem:[#allocation11] sm:$0xff]  ;;  %v170_v15 = vld [vmem:[#allocation11 + $0x8] sm:$0xff]  ;;  %s396_s17 = scalar_lea.vmem %s228_s15, 128  ;;  %p401_p7 = scmp.lt.s32.totalorder %s228_s15, %s228_s15 }
  0x6f   :  { %v107_v10 = vmul.f32 %v104_v3, %v104_v3  ;;  %v132_v12 = vand.u32 2147483647, %v127_v9  ;;  %v171_v18 = vadd.f32 %v170_v15, %v169_v14  ;;  %v128_v22 = vld [vmem:[#allocation10] sm:$0xff]  ;;  %v129_v24 = vmax.f32 %v127_v9, 0.0  ;;  %v181_v33 = vld [vmem:[%s595_s7] sm:$0xff]  ;;  %p397_p6 = scmp.ne.s32.totalorder %s228_s15, %s396_s17  ;;  %p402_p8 = scmp.lt.s32.totalorder %s396_s17, %s396_s17 }
  0x70   :  { %v159_v11 = vadd.f32 %v158_v7, %v157_v5  ;;  %v117_v13 = vmul.f32 %v106_v8, %v106_v8  ;;  %v130_v25 = vmul.f32 %v128_v22, %v127_v9 }
  0x71   :  { %108 = vadd.xlane.f32.xlu0 %v107_v10  ;;  %v133_v16 = vsub.f32 0.0, %v132_v12  ;;  %v191_v12 = vlaneseq  ;;  %p403_p9 = por %p402_p8, %p401_p7 }
  0x72   :  { %160 = vadd.xlane.f32.xlu1 %v159_v11  ;;  %v131_v29 = vsub.f32 %v129_v24, %v130_v25 }
  0x73   :  { %v134_v17 = vmul.f32 1.442695, %v133_v16  ;;  %v194_v14 = vand.u32 127, %v191_v12  ;;  %p404_p10 = pnand %p403_p9, %p397_p6 }
  0x75   :  { %118 = vadd.xlane.f32.xlu0 %v117_v13  ;;  %260 = vpow2.f32 %v134_v17  ;;  %v192_v13 = vshrl.u32 %v191_v12, 7  ;;  %vm196_vm2 = vcmp.eq.s32.totalorder %v194_v14, 0  ;;  %vm200_vm4 = vcmp.eq.s32.totalorder %v194_v14, 1 }
  0x76   :  { %vm204_vm5 = vcmp.eq.s32.totalorder %v194_v14, 2  ;;  %vm208_vm6 = vcmp.eq.s32.totalorder %v194_v14, 3  ;;  %vm212_vm8 = vcmp.eq.s32.totalorder %v194_v14, 4  ;;  %vm216_vm11 = vcmp.eq.s32.totalorder %v194_v14, 5 }
  0x77   :  { %vm195_vm1 = vcmp.eq.s32.totalorder %v192_v13, 0 }
  0x78   :  { %vm197_vm3 = vmand %vm195_vm1, %vm196_vm2 }
  0x79   :  { %172 = vadd.xlane.f32.xlu0 %v171_v18  ;;  %vm201_vm7 = vmand %vm195_vm1, %vm200_vm4 }
  0x7a   :  { %vm205_vm9 = vmand %vm195_vm1, %vm204_vm5 }
  0x7b   :  { %vm209_vm10 = vmand %vm195_vm1, %vm208_vm6 }
  0x7c   :  { %vm213_vm12 = vmand %vm195_vm1, %vm212_vm8 }
  0x7d   :  { %vm217_vm13 = vmand %vm195_vm1, %vm216_vm11 }
  0x7f   :  { %v261_v19 = vpop.eup %260 }
  0x80   :  { %v136_v20 = vadd.f32 1.0, %v261_v19  ;;  %v139_v21 = vmul.f32 -0.5, %v261_v19  ;;  %v142_v26 = vand.u32 2147483647, %v261_v19 }
  0x82   :  { %262 = vlog2.f32 %v136_v20  ;;  %v140_v23 = vadd.f32 1.0, %v139_v21  ;;  %vm143_vm0 = vcmp.lt.f32.partialorder %v142_v26, 0.0004427343 }
  0x84   :  { %v141_v27 = vmul.f32 %v261_v19, %v140_v23 }
  0x8c   :  { %v263_v28 = vpop.eup %262 }
  0x8d   :  { %v138_v30 = vmul.f32 0.6931472, %v263_v28 }
  0x8f   :  { %v144_v31 = vsel %vm143_vm0, %v141_v27, %v138_v30 }
  0x90   :  { %v145_v32 = vadd.f32 %v144_v31, %v131_v29 }
  0x92   :  { %146 = vadd.xlane.f32.xlu1 %v145_v32 }
  0x96   :  { %182 = vadd.xlane.f32.xlu1 %v181_v33 }
  0xfe   :  { %v109_v34 = vpop.xlane.xlu0 %108 }
  0xff   :  { %v110_v35 = vrot.slane %v109_v34, 4  ;;  %v161_v48 = vpop.xlane.xlu1 %160 }
 0x100   :  { %v162_v50 = vrot.slane %v161_v48, 4 }
 0x101   :  { %v111_v36 = vadd.f32 %v110_v35, %v109_v34 }
 0x102   :  { %v119_v37 = vpop.xlane.xlu0 %118  ;;  %v163_v52 = vadd.f32 %v162_v50, %v161_v48 }
 0x103   :  { %v112_v38 = vrot.slane %v111_v36, 2  ;;  %v120_v39 = vrot.slane %v119_v37, 4 }
 0x104   :  { %v164_v54 = vrot.slane %v163_v52, 2 }
 0x105   :  { %v121_v40 = vadd.f32 %v120_v39, %v119_v37  ;;  %v113_v41 = vadd.f32 %v112_v38, %v111_v36 }
 0x106   :  { %v173_v49 = vpop.xlane.xlu0 %172  ;;  %v165_v60 = vadd.f32 %v164_v54, %v163_v52 }
 0x107   :  { %v122_v42 = vrot.slane %v121_v40, 2  ;;  %v114_v43 = vrot.slane %v113_v41, 1  ;;  %v174_v51 = vrot.slane %v173_v49, 4 }
 0x108   :  { %v166_v2 = vrot.slane %v165_v60, 1 }
 0x109   :  { %v115_v44 = vadd.f32 %v114_v43, %v113_v41  ;;  %v123_v45 = vadd.f32 %v122_v42, %v121_v40  ;;  %v175_v53 = vadd.f32 %v174_v51, %v173_v49 }
 0x10a   :  { %v167_v8 = vadd.f32 %v166_v2, %v165_v60 }
 0x10b   :  { %239 = vpush %v115_v44  ;;  %v124_v46 = vrot.slane %v123_v45, 1  ;;  %v176_v56 = vrot.slane %v175_v53, 2 }
 0x10d   :  { %v125_v47 = vadd.f32 %v124_v46, %v123_v45  ;;  %v177_v61 = vadd.f32 %v176_v56, %v175_v53 }
 0x10f   :  { %241 = vpush %v125_v47  ;;  %v178_v5 = vrot.slane %v177_v61, 1 }
 0x111   :  { %v179_v9 = vadd.f32 %v178_v5, %v177_v61 }
 0x11f   :  { %v147_v55 = vpop.xlane.xlu1 %146 }
 0x120   :  { %v148_v57 = vrot.slane %v147_v55, 4 }
 0x122   :  { %v149_v58 = vadd.f32 %v148_v57, %v147_v55 }
 0x123   :  { %v183_v59 = vpop.xlane.xlu1 %182 }
 0x124   :  { %v150_v62 = vrot.slane %v149_v58, 2  ;;  %v184_v63 = vrot.slane %v183_v59, 4 }
 0x126   :  { %v185_v0 = vadd.f32 %v184_v63, %v183_v59  ;;  %v151_v1 = vadd.f32 %v150_v62, %v149_v58 }
 0x128   :  { %v186_v3 = vrot.slane %v185_v0, 2  ;;  %v152_v4 = vrot.slane %v151_v1, 1 }
 0x12a   :  { %v187_v6 = vadd.f32 %v186_v3, %v185_v0  ;;  %v153_v7 = vadd.f32 %v152_v4, %v151_v1 }
 0x12c   :  { %243 = vpush %v153_v7  ;;  %v188_v10 = vrot.slane %v187_v6, 1 }
 0x12d   :  { %245 = vpush %v167_v8 }
 0x12e   :  { %247 = vpush %v179_v9  ;;  %v189_v11 = vadd.f32 %v188_v10, %v187_v6 }
 0x130   :  { %249 = vpush %v189_v11 }
 0x13c   :  { %s240_s7 = spop %239 }
 0x13d   :  { %v198_v15 = vstv %s240_s7 }
 0x13e   :  { %v199_v16 = vsel %vm197_vm3, %v198_v15, 0.0 }
 0x140   :  { %s242_s9 = spop %241 }
 0x141   :  { %v202_v17 = vstv %s242_s9 }
 0x142   :  { %v203_v18 = vsel %vm201_vm7, %v202_v17, %v199_v16 }
 0x15d   :  { %s244_s11 = spop %243 }
 0x15e   :  { %v206_v19 = vstv %s244_s11  ;;  %s246_s12 = spop %245 }
 0x15f   :  { %v207_v20 = vsel %vm205_vm9, %v206_v19, %v203_v18  ;;  %v210_v21 = vstv %s246_s12  ;;  %s248_s13 = spop %247 }
 0x160   :  { %v211_v22 = vsel %vm209_vm10, %v210_v21, %v207_v20  ;;  %v214_v23 = vstv %s248_s13 }
 0x161   :  { %v215_v24 = vsel %vm213_vm12, %v214_v23, %v211_v22  ;;  %s250_s16 = spop %249 }
 0x162   :  { %v218_v25 = vstv %s250_s16 }
 0x163   :  { %v219_v26 = vsel %vm217_vm13, %v218_v25, %v215_v24 }
 0x164   :  { %220 = vst [vmem:[#allocation13] sm:$0xff] %v219_v26 }
 0x165   :  { %407 = shalt.err (!%p404_p10)
}
 0x166   :  { %s408_s3 = scalar_lea.hbm %s596_s8, 128 }
 0x167   :  { %p409_p11 = scmp.ne.s32.totalorder %s596_s8, %s408_s3  ;;  %p412_p12 = scmp.lt.u32.totalorder %s408_s3, %s596_s8 }
 0x169   :  { %p414_p13 = pnand %p412_p12, %p409_p11 }
 0x16b   :  { %417 = shalt.err (!%p414_p13)
}
 0x16c   :  { %230 = dma.vmem_to_hbm [thread:$0]  %s228_s15, 128, %s596_s8, [#allocation4]  }
 0x16d   :  { %426 = dma.done.wait [#allocation4], 128  }
 0x16e   :  { %427 = vsyncadd [#allocation4], 4294967168 }
 0x16f   :  { %234 = vsyncpa [#allocation3], 1 }
 0x170   :  { %235 = vsyncpa [#allocation6], 1 }
 0x171   :  { %236 = vsyncpa [#allocation9], 1 }
 0x172   :  { %237 = vsyncpa [#allocation12], 1 }
 0x173   :  { %238 = vsyncpa [#allocation4], 1 }

</bundles_post_ra>
